<compile_context>
chip_gen: v5e
topology: v5e:2x2
jax: 0.10.0
libtpu: 0.0.40
codegen_flags: <defaults>
</compile_context>

<pallas_src>
import functools

import jax
import jax.numpy as jnp
import numpy as np
from jax import lax
from jax.experimental import pallas as pl
from jax.experimental.pallas import tpu as pltpu


def spatial_attention_kernel(x_ref, w_ref, b_ref, o_ref,
                             q_scr, k_scr, v_scr, *,
                             cq, h_img, w_img, hw_valid):
    """Grid = (B, HW_pad // TQ).

    x_ref : (C, HWp)        input, resident per batch element
    w_ref : (6*Cq + C, C)   fused conv weights, rows = [qL,qC,qR,kU,kC,kD,v]
    b_ref : (6*Cq + C, 1)   fused biases (only centre-tap / value rows nonzero)
    o_ref : (C, TQ)         output tile
    q_scr, k_scr : (Cq, HWp) bf16 scratch   (cached once per batch element)
    v_scr : (C, HWp)         bf16 scratch
    """
    C, HWp = x_ref.shape
    TQ = o_ref.shape[-1]
    t = pl.program_id(1)

    col = lax.broadcasted_iota(jnp.int32, (1, HWp), 1)       # flat spatial idx

    # ---- conv stage: once per batch element (t == 0), cached in VMEM -------
    @pl.when(t == 0)
    def _():
        x = x_ref[...]                                        # (C, HWp) f32
        # One fused MXU matmul for all 7 conv products; biases ride on the
        # (never masked/rolled) centre taps, so the combine below applies
        # each bias exactly once.
        fused = jnp.dot(w_ref[...], x,
                        preferred_element_type=jnp.float32) + b_ref[...]
        t0, t1, t2 = fused[0 * cq:1 * cq], fused[1 * cq:2 * cq], fused[2 * cq:3 * cq]
        u0, u1, u2 = fused[3 * cq:4 * cq], fused[4 * cq:5 * cq], fused[5 * cq:6 * cq]
        v = fused[6 * cq:]

        # query: 1x3 conv (taps at w-1, w, w+1); BN scale pre-folded.
        w_idx = col % w_img
        q = (jnp.where(w_idx > 0, pltpu.roll(t0, 1, axis=1), 0.0)
             + t1
             + jnp.where(w_idx < w_img - 1,
                         pltpu.roll(t2, HWp - 1, axis=1), 0.0))
        q_scr[...] = jnp.maximum(q, 0.0).astype(jnp.bfloat16)

        # key: 3x1 conv (taps at h-1, h, h+1); BN scale pre-folded.
        k = (jnp.where(col >= w_img, pltpu.roll(u0, w_img, axis=1), 0.0)
             + u1
             + jnp.where(col < (h_img - 1) * w_img,
                         pltpu.roll(u2, HWp - w_img, axis=1), 0.0))
        k_scr[...] = jnp.maximum(k, 0.0).astype(jnp.bfloat16)

        # value: 1x1 conv (gamma pre-folded into the weights / bias).
        v_scr[...] = v.astype(jnp.bfloat16)

    # ---- attention for this query tile --------------------------------------
    q0 = pl.multiple_of(t * TQ, TQ)
    q_tile = q_scr[:, pl.ds(q0, TQ)]                          # (Cq, TQ) bf16

    # scores (TQ, HWp): bf16 operands / f32 accumulation; contraction K = Cq.
    s = lax.dot_general(q_tile, k_scr[...], (((0,), (0,)), ((), ())),
                        preferred_element_type=jnp.float32)
    if hw_valid != HWp:                                       # mask padded keys
        s = jnp.where(col < hw_valid, s, -1e30)

    # softmax over keys; normalisation via approx EUP reciprocal (no divides).
    s = s - jnp.max(s, axis=-1, keepdims=True)
    prob = jnp.exp(s)
    prob = prob * pl.reciprocal(jnp.sum(prob, axis=-1, keepdims=True),
                                approx=True)

    # dominant matmul: (C, TQ) = v @ prob^T, bf16 operands / f32 accumulation.
    w_t = lax.dot_general(v_scr[...], prob.astype(jnp.bfloat16),
                          (((1,), (1,)), ((), ())),
                          preferred_element_type=jnp.float32)

    o_ref[...] = (w_t + x_ref[:, pl.ds(q0, TQ)]).astype(o_ref.dtype)


def spatial_attention_block(x, p, tq=None):
    B, C, H, W = x.shape
    HW = H * W
    Cq = p["wq"].shape[0]
    eps = 1e-5

    # Lane-dense spatial axis.  (A non-multiple-of-128 HW costs one extra HBM
    # read+write of x for the pad; it is skipped when HW is already aligned.)
    HW_pad = ((HW + 127) // 128) * 128
    if tq is None:
        # 256 (not 512) default keeps the (TQ, HW_pad) score/prob temporaries
        # inside v7x's smaller VMEM budget.
        tq = next((c for c in (256, 128) if HW_pad % c == 0), HW_pad)
    assert HW_pad % tq == 0

    x_flat = x.reshape(B, C, HW)
    if HW_pad != HW:
        x_flat = jnp.pad(x_flat, ((0, 0), (0, 0), (0, HW_pad - HW)))

    # Fold eval-mode BN into the conv weights/biases, gamma into the value
    # conv, and fuse all seven conv products into one weight matrix.
    sq = p["bnq_w"] / jnp.sqrt(p["bnq_var"] + eps)
    bq = (p["bq"] - p["bnq_mean"]) * sq + p["bnq_b"]               # (Cq,)
    sk = p["bnk_w"] / jnp.sqrt(p["bnk_var"] + eps)
    bk = (p["bk"] - p["bnk_mean"]) * sk + p["bnk_b"]               # (Cq,)

    wq_taps = [p["wq"][:, :, 0, i] * sq[:, None] for i in range(3)]  # 3x(Cq,C)
    wk_taps = [p["wk"][:, :, i, 0] * sk[:, None] for i in range(3)]  # 3x(Cq,C)
    gamma = p["gamma"].reshape(())
    wv = p["wv"][:, :, 0, 0] * gamma                                 # (C, C)
    bv = p["bv"] * gamma                                             # (C,)

    zq = jnp.zeros_like(bq)
    w_fused = jnp.concatenate(wq_taps + wk_taps + [wv], axis=0)      # (6Cq+C, C)
    b_fused = jnp.concatenate([zq, bq, zq, zq, bk, zq, bv]).reshape(-1, 1)
    R = 6 * Cq + C

    kernel = functools.partial(spatial_attention_kernel,
                               cq=Cq, h_img=H, w_img=W, hw_valid=HW)

    # Rough VMEM budget: double-buffered x/out blocks, bf16 q/k/v caches, and
    # the (tq, HW_pad) score/prob temporaries (+ headroom); clamped so it stays
    # inside v7x's 64 MiB while not starving v5e/v6e.
    vmem_est = (2 * C * HW_pad * 4 + 2 * C * tq * 4
                + (2 * Cq + C) * HW_pad * 2
                + 8 * tq * HW_pad * 4 + 2 * R * C * 4)
    vmem_limit = int(min(max(vmem_est, 32 << 20), 100 << 20))

    out_flat = pl.pallas_call(
        kernel,
        out_shape=jax.ShapeDtypeStruct((B, C, HW_pad), x.dtype),
        grid=(B, HW_pad // tq),
        in_specs=[
            # x is resident per batch element (same block for every t).
            pl.BlockSpec((pl.Squeezed(), C, HW_pad), lambda b, t: (b, 0, 0)),
            pl.BlockSpec((R, C), lambda b, t: (0, 0)),   # fused conv weights
            pl.BlockSpec((R, 1), lambda b, t: (0, 0)),   # fused biases
        ],
        out_specs=pl.BlockSpec((pl.Squeezed(), C, tq), lambda b, t: (b, 0, t)),
        scratch_shapes=[pltpu.VMEM((Cq, HW_pad), jnp.bfloat16),   # q cache
                        pltpu.VMEM((Cq, HW_pad), jnp.bfloat16),   # k cache
                        pltpu.VMEM((C, HW_pad), jnp.bfloat16)],   # v cache
        compiler_params=pltpu.CompilerParams(
            # Batch axis parallel (sharded over v7x's 2 TCs); the t axis is
            # stateful (cached q/k/v scratch) so it must stay "arbitrary".
            dimension_semantics=("parallel", "arbitrary"),
            vmem_limit_bytes=vmem_limit),
        # TODO(synk): for very large HW (>~4-8K) add key-dim tiling with an
        # online (flash-style) softmax so the (tq, HW_pad) temporaries stay
        # bounded on v7x's 64 MiB VMEM; not needed at these shapes.
    )(x_flat, w_fused, b_fused)

    return out_flat[:, :, :HW].reshape(B, C, H, W)


def ref_forward(x, p):
    """Pure-JAX reference (mirrors the PyTorch forward, eval-mode BN)."""
    eps = 1e-5
    dn = ("NCHW", "OIHW", "NCHW")
    B, C, H, W = x.shape

    q = lax.conv_general_dilated(x, p["wq"], (1, 1), ((0, 0), (1, 1)),
                                 dimension_numbers=dn) + p["bq"][None, :, None, None]
    q = (q - p["bnq_mean"][None, :, None, None]) / jnp.sqrt(p["bnq_var"] + eps)[None, :, None, None]
    q = q * p["bnq_w"][None, :, None, None] + p["bnq_b"][None, :, None, None]
    q = jax.nn.relu(q)

    k = lax.conv_general_dilated(x, p["wk"], (1, 1), ((1, 1), (0, 0)),
                                 dimension_numbers=dn) + p["bk"][None, :, None, None]
    k = (k - p["bnk_mean"][None, :, None, None]) / jnp.sqrt(p["bnk_var"] + eps)[None, :, None, None]
    k = k * p["bnk_w"][None, :, None, None] + p["bnk_b"][None, :, None, None]
    k = jax.nn.relu(k)

    v = lax.conv_general_dilated(x, p["wv"], (1, 1), ((0, 0), (0, 0)),
                                 dimension_numbers=dn) + p["bv"][None, :, None, None]

    pq = q.reshape(B, -1, H * W).transpose(0, 2, 1)
    pk = k.reshape(B, -1, H * W)
    aff = jax.nn.softmax(pq @ pk, axis=-1)
    pv = v.reshape(B, -1, H * W)
    weights = (pv @ aff.transpose(0, 2, 1)).reshape(B, C, H, W)
    return p["gamma"].reshape(()) * weights + x


def _make_params(key, C):
    Cq = C // 8
    ks = jax.random.split(key, 15)
    return {
        "wq": jax.random.normal(ks[0], (Cq, C, 1, 3), jnp.float32) * 0.2,
        "bq": jax.random.normal(ks[1], (Cq,), jnp.float32) * 0.1,
        "bnq_w": 1.0 + 0.1 * jax.random.normal(ks[2], (Cq,), jnp.float32),
        "bnq_b": 0.1 * jax.random.normal(ks[3], (Cq,), jnp.float32),
        "bnq_mean": 0.1 * jax.random.normal(ks[4], (Cq,), jnp.float32),
        "bnq_var": jax.random.uniform(ks[5], (Cq,), jnp.float32, 0.5, 1.5),
        "wk": jax.random.normal(ks[6], (Cq, C, 3, 1), jnp.float32) * 0.2,
        "bk": jax.random.normal(ks[7], (Cq,), jnp.float32) * 0.1,
        "bnk_w": 1.0 + 0.1 * jax.random.normal(ks[8], (Cq,), jnp.float32),
        "bnk_b": 0.1 * jax.random.normal(ks[9], (Cq,), jnp.float32),
        "bnk_mean": 0.1 * jax.random.normal(ks[10], (Cq,), jnp.float32),
        "bnk_var": jax.random.uniform(ks[11], (Cq,), jnp.float32, 0.5, 1.5),
        "wv": jax.random.normal(ks[12], (C, C, 1, 1), jnp.float32) * 0.2,
        "bv": jax.random.normal(ks[13], (C,), jnp.float32) * 0.1,
        # module init is gamma=0 (output == x); use a nonzero value so the
        # attention path is actually exercised.
        "gamma": jnp.array([0.5], jnp.float32),
    }


if __name__ == "__main__":
    root = jax.random.PRNGKey(0)
    kp, kx1, kx2 = jax.random.split(root, 3)
    params = _make_params(kp, 16)

    # Case 1: aligned HW (16x16 -> 256), tq=128 -> 2 query tiles per batch
    # element: exercises the once-per-b cached conv stage + tiled attention.
    x1 = jax.random.normal(kx1, (2, 16, 16, 16), jnp.float32)
    out1 = jax.block_until_ready(spatial_attention_block(x1, params, tq=128))
    ref1 = jax.block_until_ready(ref_forward(x1, params))

    # Case 2: unaligned HW (10x12 -> 120, padded to 128): exercises the padded
    # key-column mask path.
    x2 = jax.random.normal(kx2, (1, 16, 10, 12), jnp.float32)
    out2 = jax.block_until_ready(spatial_attention_block(x2, params))
    ref2 = jax.block_until_ready(ref_forward(x2, params))

    assert out1.shape == x1.shape and out2.shape == x2.shape
    # bf16 operands for the score and v@p^T matmuls (f32 accumulation) plus the
    # approx softmax reciprocal -> loosened tolerance vs the pure-f32 reference.
    np.testing.assert_allclose(np.asarray(out1), np.asarray(ref1),
                               rtol=5e-2, atol=5e-2)
    np.testing.assert_allclose(np.asarray(out2), np.asarray(ref2),
                               rtol=5e-2, atol=5e-2)
    print("KERNEL_OK")
</pallas_src>

<mosaic_0001>
module attributes {stable_mosaic.version = 11 : i64} {
  func.func @spatial_attention_kernel(%arg0: i32, %arg1: i32, %arg2: memref<1x16x256xf32, #tpu.memory_space<vmem>>, %arg3: memref<28x16xf32, #tpu.memory_space<vmem>>, %arg4: memref<28x1xf32, #tpu.memory_space<vmem>>, %arg5: memref<1x16x128xf32, #tpu.memory_space<vmem>>, %arg6: memref<2x256xbf16, #tpu.memory_space<vmem>>, %arg7: memref<2x256xbf16, #tpu.memory_space<vmem>>, %arg8: memref<16x256xbf16, #tpu.memory_space<vmem>>) attributes {dimension_semantics = [#tpu.dimension_semantics<parallel>, #tpu.dimension_semantics<arbitrary>], iteration_bounds = array<i64: 2, 2>, scalar_prefetch = 0 : i64, scratch_operands = 3 : i64, tpu.core_type = #tpu.core_type<tc>, window_params = [{transform_indices = @transform_0, window_bounds = array<i64: 1, 16, 256>}, {pipeline_mode = #tpu.pipeline_mode<synchronous>, transform_indices = @transform_1, window_bounds = array<i64: 28, 16>}, {pipeline_mode = #tpu.pipeline_mode<synchronous>, transform_indices = @transform_2, window_bounds = array<i64: 28, 1>}, {transform_indices = @transform_3, window_bounds = array<i64: 1, 16, 128>}]} {
    %0 = tpu.iota {dimensions = array<i32: 1>} : vector<1x256xi32>
    %c0_i32 = arith.constant 0 : i32
    %1 = arith.cmpi eq, %arg1, %c0_i32 : i32
    %2 = arith.extui %1 : i1 to i32
    %c0_i32_0 = arith.constant 0 : i32
    %3 = arith.cmpi ne, %2, %c0_i32_0 : i32
    scf.if %3 {
      %c0_13 = arith.constant 0 : index
      %c0_14 = arith.constant 0 : index
      %c0_15 = arith.constant 0 : index
      %30 = vector.load %arg2[%c0_13, %c0_14, %c0_15] : memref<1x16x256xf32, #tpu.memory_space<vmem>>, vector<1x16x256xf32>
      %31 = vector.shape_cast %30 : vector<1x16x256xf32> to vector<16x256xf32>
      %c0_16 = arith.constant 0 : index
      %c0_17 = arith.constant 0 : index
      %32 = vector.load %arg3[%c0_16, %c0_17] : memref<28x16xf32, #tpu.memory_space<vmem>>, vector<28x16xf32>
      %cst_18 = arith.constant dense<0.000000e+00> : vector<28x256xf32>
      %33 = tpu.matmul %32, %31, %cst_18 {dimension_numbers = #tpu.dot_dimension_numbers<[1], [0], [0], [1], [0, 0, 1, 1], [], []>} : vector<28x16xf32>, vector<16x256xf32>, vector<28x256xf32> -> vector<28x256xf32>
      %c0_19 = arith.constant 0 : index
      %c0_20 = arith.constant 0 : index
      %34 = vector.load %arg4[%c0_19, %c0_20] : memref<28x1xf32, #tpu.memory_space<vmem>>, vector<28x1xf32>
      %35 = vector.broadcast %34 : vector<28x1xf32> to vector<28x256xf32>
      %36 = arith.addf %33, %35 : vector<28x256xf32>
      %37 = vector.extract_strided_slice %36 {offsets = [0, 0], sizes = [2, 256], strides = [1, 1]} : vector<28x256xf32> to vector<2x256xf32>
      %38 = vector.extract_strided_slice %36 {offsets = [2, 0], sizes = [2, 256], strides = [1, 1]} : vector<28x256xf32> to vector<2x256xf32>
      %39 = vector.extract_strided_slice %36 {offsets = [4, 0], sizes = [2, 256], strides = [1, 1]} : vector<28x256xf32> to vector<2x256xf32>
      %40 = vector.extract_strided_slice %36 {offsets = [6, 0], sizes = [2, 256], strides = [1, 1]} : vector<28x256xf32> to vector<2x256xf32>
      %41 = vector.extract_strided_slice %36 {offsets = [8, 0], sizes = [2, 256], strides = [1, 1]} : vector<28x256xf32> to vector<2x256xf32>
      %42 = vector.extract_strided_slice %36 {offsets = [10, 0], sizes = [2, 256], strides = [1, 1]} : vector<28x256xf32> to vector<2x256xf32>
      %43 = vector.extract_strided_slice %36 {offsets = [12, 0], sizes = [16, 256], strides = [1, 1]} : vector<28x256xf32> to vector<16x256xf32>
      %c16_i32 = arith.constant 16 : i32
      %c0_i32_21 = arith.constant 0 : i32
      %44 = arith.cmpi eq, %c16_i32, %c0_i32_21 : i32
      %c1_i32 = arith.constant 1 : i32
      %45 = arith.select %44, %c1_i32, %c16_i32 : i32
      %46 = vector.broadcast %45 : i32 to vector<1x256xi32>
      %47 = arith.remsi %0, %46 : vector<1x256xi32>
      %c0_i32_22 = arith.constant 0 : i32
      %48 = vector.broadcast %c0_i32_22 : i32 to vector<1x256xi32>
      %49 = arith.cmpi ne, %47, %48 : vector<1x256xi32>
      %c0_i32_23 = arith.constant 0 : i32
      %50 = vector.broadcast %c0_i32_23 : i32 to vector<1x256xi32>
      %51 = arith.cmpi slt, %47, %50 : vector<1x256xi32>
      %c0_i32_24 = arith.constant 0 : i32
      %52 = arith.cmpi slt, %45, %c0_i32_24 : i32
      %53 = vector.broadcast %52 : i1 to vector<1x256xi1>
      %54 = vector.broadcast %53 : vector<1x256xi1> to vector<1x256xi1>
      %55 = arith.xori %51, %54 : vector<1x256xi1>
      %56 = arith.andi %55, %49 : vector<1x256xi1>
      %57 = vector.broadcast %45 : i32 to vector<1x256xi32>
      %58 = arith.addi %47, %57 : vector<1x256xi32>
      %59 = arith.select %56, %58, %47 : vector<1x256xi1>, vector<1x256xi32>
      %c0_i32_25 = arith.constant 0 : i32
      %60 = vector.broadcast %c0_i32_25 : i32 to vector<1x256xi32>
      %61 = arith.cmpi sgt, %59, %60 : vector<1x256xi32>
      %c1_i32_26 = arith.constant 1 : i32
      %62 = tpu.dynamic_rotate %37 by %c1_i32_26 dim 1 : vector<2x256xf32>, i32 -> vector<2x256xf32>
      %cst_27 = arith.constant 0.000000e+00 : f32
      %63 = vector.shape_cast %61 : vector<1x256xi1> to vector<1x256xi1>
      %64 = vector.broadcast %63 : vector<1x256xi1> to vector<2x256xi1>
      %65 = vector.broadcast %cst_27 : f32 to vector<2x256xf32>
      %66 = arith.select %64, %62, %65 : vector<2x256xi1>, vector<2x256xf32>
      %67 = arith.addf %66, %38 : vector<2x256xf32>
      %c15_i32 = arith.constant 15 : i32
      %68 = vector.broadcast %c15_i32 : i32 to vector<1x256xi32>
      %69 = arith.cmpi slt, %59, %68 : vector<1x256xi32>
      %c255_i32 = arith.constant 255 : i32
      %70 = tpu.dynamic_rotate %39 by %c255_i32 dim 1 : vector<2x256xf32>, i32 -> vector<2x256xf32>
      %cst_28 = arith.constant 0.000000e+00 : f32
      %71 = vector.shape_cast %69 : vector<1x256xi1> to vector<1x256xi1>
      %72 = vector.broadcast %71 : vector<1x256xi1> to vector<2x256xi1>
      %73 = vector.broadcast %cst_28 : f32 to vector<2x256xf32>
      %74 = arith.select %72, %70, %73 : vector<2x256xi1>, vector<2x256xf32>
      %75 = arith.addf %67, %74 : vector<2x256xf32>
      %cst_29 = arith.constant 0.000000e+00 : f32
      %76 = vector.broadcast %cst_29 : f32 to vector<2x256xf32>
      %77 = arith.maximumf %75, %76 : vector<2x256xf32>
      %78 = arith.truncf %77 : vector<2x256xf32> to vector<2x256xbf16>
      %c0_30 = arith.constant 0 : index
      %c0_31 = arith.constant 0 : index
      %79 = vector.load %arg6[%c0_30, %c0_31] : memref<2x256xbf16, #tpu.memory_space<vmem>>, vector<2x256xbf16>
      tpu.vector_store %arg6[%c0_30, %c0_31], %78 {strides = array<i32>} : memref<2x256xbf16, #tpu.memory_space<vmem>>, vector<2x256xbf16>,
      %c16_i32_32 = arith.constant 16 : i32
      %80 = vector.broadcast %c16_i32_32 : i32 to vector<1x256xi32>
      %81 = arith.cmpi sge, %0, %80 : vector<1x256xi32>
      %c16_i32_33 = arith.constant 16 : i32
      %82 = tpu.dynamic_rotate %40 by %c16_i32_33 dim 1 : vector<2x256xf32>, i32 -> vector<2x256xf32>
      %cst_34 = arith.constant 0.000000e+00 : f32
      %83 = vector.shape_cast %81 : vector<1x256xi1> to vector<1x256xi1>
      %84 = vector.broadcast %83 : vector<1x256xi1> to vector<2x256xi1>
      %85 = vector.broadcast %cst_34 : f32 to vector<2x256xf32>
      %86 = arith.select %84, %82, %85 : vector<2x256xi1>, vector<2x256xf32>
      %87 = arith.addf %86, %41 : vector<2x256xf32>
      %c240_i32 = arith.constant 240 : i32
      %88 = vector.broadcast %c240_i32 : i32 to vector<1x256xi32>
      %89 = arith.cmpi slt, %0, %88 : vector<1x256xi32>
      %c240_i32_35 = arith.constant 240 : i32
      %90 = tpu.dynamic_rotate %42 by %c240_i32_35 dim 1 : vector<2x256xf32>, i32 -> vector<2x256xf32>
      %cst_36 = arith.constant 0.000000e+00 : f32
      %91 = vector.shape_cast %89 : vector<1x256xi1> to vector<1x256xi1>
      %92 = vector.broadcast %91 : vector<1x256xi1> to vector<2x256xi1>
      %93 = vector.broadcast %cst_36 : f32 to vector<2x256xf32>
      %94 = arith.select %92, %90, %93 : vector<2x256xi1>, vector<2x256xf32>
      %95 = arith.addf %87, %94 : vector<2x256xf32>
      %cst_37 = arith.constant 0.000000e+00 : f32
      %96 = vector.broadcast %cst_37 : f32 to vector<2x256xf32>
      %97 = arith.maximumf %95, %96 : vector<2x256xf32>
      %98 = arith.truncf %97 : vector<2x256xf32> to vector<2x256xbf16>
      %c0_38 = arith.constant 0 : index
      %c0_39 = arith.constant 0 : index
      %99 = vector.load %arg7[%c0_38, %c0_39] : memref<2x256xbf16, #tpu.memory_space<vmem>>, vector<2x256xbf16>
      tpu.vector_store %arg7[%c0_38, %c0_39], %98 {strides = array<i32>} : memref<2x256xbf16, #tpu.memory_space<vmem>>, vector<2x256xbf16>,
      %100 = arith.truncf %43 : vector<16x256xf32> to vector<16x256xbf16>
      %c0_40 = arith.constant 0 : index
      %c0_41 = arith.constant 0 : index
      %101 = vector.load %arg8[%c0_40, %c0_41] : memref<16x256xbf16, #tpu.memory_space<vmem>>, vector<16x256xbf16>
      tpu.vector_store %arg8[%c0_40, %c0_41], %100 {strides = array<i32>} : memref<16x256xbf16, #tpu.memory_space<vmem>>, vector<16x256xbf16>,
    } else {
    }
    %c128_i32 = arith.constant 128 : i32
    %4 = arith.muli %arg1, %c128_i32 : i32
    %5 = tpu.assume_multiple %4, 128 : i32
    %c0 = arith.constant 0 : index
    %6 = arith.index_cast %5 : i32 to index
    %7 = vector.load %arg6[%c0, %6] : memref<2x256xbf16, #tpu.memory_space<vmem>>, vector<2x128xbf16>
    %c0_1 = arith.constant 0 : index
    %c0_2 = arith.constant 0 : index
    %8 = vector.load %arg7[%c0_1, %c0_2] : memref<2x256xbf16, #tpu.memory_space<vmem>>, vector<2x256xbf16>
    %cst = arith.constant dense<0.000000e+00> : vector<128x256xf32>
    %9 = tpu.matmul %7, %8, %cst {dimension_numbers = #tpu.dot_dimension_numbers<[0], [0], [1], [1], [0, 1, 1, 1], [], []>} : vector<2x128xbf16>, vector<2x256xbf16>, vector<128x256xf32> -> vector<128x256xf32>
    %cst_3 = arith.constant dense<0xFF800000> : vector<128xf32>
    %10 = vector.multi_reduction <maximumf>, %9, %cst_3 [1] : vector<128x256xf32> to vector<128xf32>
    %11 = vector.shape_cast %10 : vector<128xf32> to vector<128x1xf32>
    %12 = vector.broadcast %11 : vector<128x1xf32> to vector<128x256xf32>
    %13 = arith.subf %9, %12 : vector<128x256xf32>
    %14 = math.exp %13 : vector<128x256xf32>
    %cst_4 = arith.constant dense<0.000000e+00> : vector<128xf32>
    %15 = vector.multi_reduction <add>, %14, %cst_4 [1] : vector<128x256xf32> to vector<128xf32>
    %16 = vector.shape_cast %15 : vector<128xf32> to vector<128x1xf32>
    %17 = tpu.reciprocal %16 {approx = true} : vector<128x1xf32> -> vector<128x1xf32>
    %18 = vector.broadcast %17 : vector<128x1xf32> to vector<128x256xf32>
    %19 = arith.mulf %14, %18 : vector<128x256xf32>
    %c0_5 = arith.constant 0 : index
    %c0_6 = arith.constant 0 : index
    %20 = vector.load %arg8[%c0_5, %c0_6] : memref<16x256xbf16, #tpu.memory_space<vmem>>, vector<16x256xbf16>
    %21 = arith.truncf %19 : vector<128x256xf32> to vector<128x256xbf16>
    %cst_7 = arith.constant dense<0.000000e+00> : vector<16x128xf32>
    %22 = tpu.matmul %20, %21, %cst_7 {dimension_numbers = #tpu.dot_dimension_numbers<[1], [1], [0], [0], [0, 0, 1, 0], [], []>} : vector<16x256xbf16>, vector<128x256xbf16>, vector<16x128xf32> -> vector<16x128xf32>
    %c0_8 = arith.constant 0 : index
    %c0_9 = arith.constant 0 : index
    %23 = arith.index_cast %5 : i32 to index
    %24 = vector.load %arg2[%c0_8, %c0_9, %23] : memref<1x16x256xf32, #tpu.memory_space<vmem>>, vector<1x16x128xf32>
    %25 = vector.shape_cast %24 : vector<1x16x128xf32> to vector<16x128xf32>
    %26 = arith.addf %22, %25 : vector<16x128xf32>
    %c0_10 = arith.constant 0 : index
    %c0_11 = arith.constant 0 : index
    %c0_12 = arith.constant 0 : index
    %27 = vector.load %arg5[%c0_10, %c0_11, %c0_12] : memref<1x16x128xf32, #tpu.memory_space<vmem>>, vector<1x16x128xf32>
    %28 = vector.shape_cast %27 : vector<1x16x128xf32> to vector<16x128xf32>
    %29 = vector.shape_cast %26 : vector<16x128xf32> to vector<1x16x128xf32>
    tpu.vector_store %arg5[%c0_10, %c0_11, %c0_12], %29 {strides = array<i32>} : memref<1x16x128xf32, #tpu.memory_space<vmem>>, vector<1x16x128xf32>,
    return
  }
  func.func @transform_0(%arg0: i32, %arg1: i32) -> (i32, i32, i32) {
    %c0_i32 = arith.constant 0 : i32
    %c0_i32_0 = arith.constant 0 : i32
    %c0_i32_1 = arith.constant 0 : i32
    return %arg0, %c0_i32, %c0_i32_0 : i32, i32, i32
  }
  func.func @transform_1(%arg0: i32, %arg1: i32) -> (i32, i32) {
    %c0_i32 = arith.constant 0 : i32
    %c0_i32_0 = arith.constant 0 : i32
    %c0_i32_1 = arith.constant 0 : i32
    return %c0_i32, %c0_i32_0 : i32, i32
  }
  func.func @transform_2(%arg0: i32, %arg1: i32) -> (i32, i32) {
    %c0_i32 = arith.constant 0 : i32
    %c0_i32_0 = arith.constant 0 : i32
    %c0_i32_1 = arith.constant 0 : i32
    return %c0_i32, %c0_i32_0 : i32, i32
  }
  func.func @transform_3(%arg0: i32, %arg1: i32) -> (i32, i32, i32) {
    %c0_i32 = arith.constant 0 : i32
    %c0_i32_0 = arith.constant 0 : i32
    return %arg0, %c0_i32, %arg1 : i32, i32, i32
  }
}

</mosaic_0001>

<bundles_post_ra>
// kernel: tpu_custom_call.1
= control target key start
LH: loop header
LB: loop body
LE: loop exit
PB: predicated region body
PF: predicated region fallthrough
CT: control target
= control target key end

     0   :  { %8 = vsyncpa [#allocation6], 0  ;;  %s1822_s0 = inlined_call_operand.vmem [shape: f32[2,16,256], index: 0, kind: input, shape index: {}]   ;;  %s1823_s1 = inlined_call_operand.vmem [shape: f32[28,16], index: 1, kind: input, shape index: {}]   ;;  %s1824_s2 = inlined_call_operand.vmem [shape: f32[28,1], index: 2, kind: input, shape index: {}]   ;;  %s1825_s3 = inlined_call_operand.hbm [shape: f32[2,16,256], index: 3, kind: output, shape index: {}]  }
   0x1   :  { %10 = vsyncpa [#allocation6 + $0x1], 0  ;;  %s1357_s12 = smov 0   ;;  %s1359_s13 = smov 0  }
   0x2   :  { %s1361_s14 = smov 0   ;;  %s1363_s15 = smov 0  }
   0x3   :  { %s1365_s16 = smov 0   ;;  %s1367_s17 = smov 0  }
   0x4   :  { %s1369_s18 = smov 0   ;;  %s1371_s19 = smov 0  }
   0x5 LB: > { %s998_s20 = sadd.s32 4294967295, %s1327_s19   ;;  %s999_s21 = sadd.s32 4294967294, %s1327_s19   ;;  %s1327_s19 = sphi %s1371_s19, %s16_s19   ;;  %s1323_s18 = sphi %s1369_s18, %s1838_s18   ;;  %s1319_s17 = sphi %s1367_s17, %s1837_s17   ;;  %s1315_s16 = sphi %s1365_s16, %s1836_s16   ;;  %s1311_s15 = sphi %s1363_s15, %s1835_s15   ;;  %s1307_s14 = sphi %s1361_s14, %s1834_s14   ;;  %s1303_s13 = sphi %s1359_s13, %s1833_s13   ;;  %s1299_s12 = sphi %s1357_s12, %s1832_s12  }
   0x6   : > { %s25_s22 = sadd.s32 1, %s1319_s17  ;;  %s28_s23 = sadd.s32 1, %s1323_s18 }
   0x7   : > { %p26_p0 = scmp.ge.s32.totalorder %s25_s22, 2  ;;  %p115_p1 = scmp.ne.s32.totalorder %s1307_s14, %s1303_s13 }
   0x8   : > { %p116_p2 = scmp.eq.s32.totalorder %s998_s20, 3  ;;  %p121_p5 = scmp.ne.s32.totalorder %s1303_s13, %s1299_s12 }
   0x9   : > { %s1840_s22 = smov (%p26_p0, %s25_s22), 0  ;;  %s1842_s23 = smov (!%p26_p0, %s28_s23), %s1323_s18 }
   0xa   : > { %s101_s24 = ssub.s32 %s1319_s17, %s1840_s22  ;;  %p1408_p3 = por %p116_p2, %p115_p1 }
   0xb   : > { %p30_p4 = scmp.ge.s32.totalorder %s1842_s23, 2  ;;  %p122_p6 = scmp.eq.s32.totalorder %s999_s21, 3 }
   0xc   : > { %p1002_p7 = scmp.ge.s32.totalorder %s1327_s19, 1  ;;  %p154_p9 = scmp.lt.s32.totalorder %s1327_s19, 5 }
   0xd   : > { %s1844_s23 = smov (%p30_p4, %s1842_s23), 0  ;;  %p1417_p8 = por %p122_p6, %p121_p5 }
   0xe   : > { %s100_s27 = ssub.s32 %s1323_s18, %s1844_s23  ;;  %s105_s28 = sadd.s32 1, %s1307_s14 }
   0xf   : > { %s102_s29 = sor.u32 %s101_s24, %s100_s27  ;;  %p155_p10 = pnand %p1002_p7, %p154_p9 }
  0x10   : > { %p103_p11 = scmp.eq.s32.totalorder %s102_s29, 0  ;;  %s175_s4 = sand.u32 (!%p155_p10), 1, %s1303_s13  }
  0x11   : > { %158 = sbr.rel (%p155_p10) target bundleno = 1203 (0x4b3), region = 32  ;;  %p178_p12 = scmp.lt.s32.totalorder (!%p155_p10), %s1315_s16, 1 }
  0x12   : > { %s1426_s30 = scalar_select %p103_p11, %s1307_s14, %s105_s28  }
  0x13   : > { %s1003_s5 = sshll.u32 (!%p155_p10), %s175_s4, 4  ;;  %p1006_p13 = scmp.ne.s32.totalorder (!%p155_p10), %s1311_s15, 0 }
  0x14   : > { %s1443_s11 = scalar_lea.vmem (!%p155_p10), [#allocation5], %s1003_s5 }
  0x16   : > { %v184_v0 = vlaneseq  ;;  %s179_s6 = scalar_select %p178_p12, %s1315_s16, 1 }
  0x17   : > { %190 = sbr.rel (%p1006_p13) target bundleno = 309 (0x135), region = 36  ;;  %s1330_s21 = smov (!%p1006_p13), 1  }
  0x18   : > { %v1432_v1 = vand.u32 127, %v184_v0  ;;  %s1047_s7 = sshll.u32 %s179_s6, 5  ;;  %s1331_s24 = smov (!%p1006_p13), 16  }
  0x19   : > { %s1441_s10 = scalar_lea.vmem %s1822_s0, %s1047_s7  ;;  %s1332_s27 = smov (!%p1006_p13), 127  }
  0x1a   : > { %v1436_v2 = vadd.s32 128, %v1432_v1  ;;  %s1333_s28 = smov (!%p1006_p13), 112  }
  0x1c   : > { %v193_v3 = vld [vmem:[%s1441_s10 + $0x10] sm:$0xff]  ;;  %v194_v4 = vld [vmem:[%s1441_s10 + $0x18] sm:$0xff]  ;;  %v191_v5 = vld [vmem:[%s1441_s10] sm:$0xff]  ;;  %vm223_vm0 = vcmask 130048   ;;  %v1329_v8 = vmov 0   ;;  %vm383_vm1 = vcmp.lt.s32.totalorder %v1432_v1, 16 }
  0x1d   : > { %250 = vmatpush.msra.mxu0 %v193_v3  ;;  %279 = vmatpush.msra.mxu1 %v194_v4  ;;  %v192_v6 = vld [vmem:[%s1441_s10 + $0x8] sm:$0xff]  ;;  %v195_v7 = vld [vmem:[%s1823_s1] sm:$0xff]  ;;  %v197_v12 = vld [vmem:[%s1823_s1 + $0x10] sm:$0xff]  ;;  %vm373_vm2 = vcmp.ge.s32.totalorder %v1432_v1, 16  ;;  %v298_v37 = vand.u32 15, %v1432_v1  ;;  %v305_v38 = vand.u32 15, %v1436_v2 }
  0x1e   : > { %1134 = vset.pattern.permute.xlu0 %v1329_v8  ;;  %v199_v9 = vld [vmem:[%s1824_s2] sm:$0xff]  ;;  %1050 = vmatpush.msra.mxu2 %v193_v3  ;;  %v196_v10 = vld [vmem:[%s1823_s1 + $0x8] sm:$0xff]  ;;  %v198_v13 = vld [vmem:[%s1823_s1 + $0x18] sm:$0xf]  ;;  %vm324_vm3 = vcmp.lt.s32.totalorder %v1432_v1, 1  ;;  %vm406_vm4 = vcmp.lt.s32.totalorder %v1432_v1, 112 }
  0x1f   : > { %251 = vmatpush.msra.mxu0 %v191_v5  ;;  %280 = vmatpush.msra.mxu1 %v192_v6  ;;  %v200_v11 = vld [vmem:[%s1824_s2 + $0x8] sm:$0xff]  ;;  %v201_v30 = vld [vmem:[%s1824_s2 + $0x10] sm:$0xff]  ;;  %v202_v31 = vld [vmem:[%s1824_s2 + $0x18] sm:$0xf]  ;;  %vm395_vm5 = vcmp.lt.s32.totalorder %v1436_v2, 240  ;;  %vm1501_vm6 = vcmp.gt.s32.totalorder %v298_v37, 0 }
  0x20   : > { %1007 = vmatmul.msk.f32.vlgmr.msra.gmra.mxu0 %vm223_vm0, %v195_v7  ;;  %1011 = vmatmul.msk.f32.vlgmr.msra.gmra.mxu1 %vm223_vm0, %v195_v7  ;;  %vm1505_vm7 = vcmp.gt.s32.totalorder %v305_v38, 0  ;;  %vm351_vm8 = vcmp.lt.s32.totalorder %v1432_v1, 127  ;;  %vm341_vm9 = vcmp.lt.s32.totalorder %v298_v37, 15  ;;  %vm342_vm10 = vcmp.lt.s32.totalorder %v305_v38, 15 }
  0x21   : > { %205 = vperm.xlu0 %1134, %v199_v9   ;;  %1052 = vmatpush.msra.mxu3 %v194_v4  ;;  %vm367_vm11 = vcmask 1040384   ;;  %vm433_vm12 = vcmask 1041408   ;;  %vm434_vm13 = vcmask 1045508  }
  0x22   : > { %1051 = vmatpush.msra.mxu2 %v191_v5  ;;  %1135 = vset.pattern.permute.xlu1 %v1329_v8  ;;  %vm435_vm14 = vmor %vm433_vm12, %vm434_vm13 }
  0x23   : > { %1053 = vmatpush.msra.mxu3 %v192_v6  ;;  %1136 = vset.pattern.permute.xlu2 %v1329_v8 }
  0x24   : > { %1009 = vmatmul.msk.f32.vlgmr.msra.gmra.mxu2 %vm223_vm0, %v197_v12  ;;  %1013 = vmatmul.msk.f32.vlgmr.msra.gmra.mxu3 %vm223_vm0, %v197_v12 }
  0x28   : > { %1008 = vmatmul.msk.f32.gmra.mxu0 %vm223_vm0, %v196_v10  ;;  %1012 = vmatmul.msk.f32.gmra.mxu1 %vm223_vm0, %v196_v10 }
  0x29   : > { %210 = vperm.xlu0 %1134, %v200_v11  }
  0x2c   : > { %1010 = vmatmul.msk.f32.gmra.mxu2 %vm223_vm0, %v198_v13  ;;  %1014 = vmatmul.msk.f32.gmra.mxu3 %vm223_vm0, %v198_v13 }
  0x93   : > { %v206_v14 = vpop.permute.xlu0 %205 }
  0x9b   : > { %v211_v21 = vpop.permute.xlu0 %210 }
  0x9d   : > { %v253_v15 = vpop.f32.mrf.mxu0  ;;  %v282_v16 = vpop.f32.mrf.mxu1 }
  0x9e   : > { %v1476_v17 = vadd.f32 %v253_v15, %v206_v14  ;;  %v283_v20 = vadd.f32 %v282_v16, %v206_v14 }
  0xa0   : > { %320 = vrot.lane.b32.xlu1 %v1476_v17, %s1330_s21  ;;  %v375_v18 = vrot.slane %v1476_v17, 6  ;;  %v343_v19 = vrot.slane %v1476_v17, 4  ;;  %v376_v24 = vrot.slane %v283_v20, 6  ;;  %v344_v28 = vrot.slane %v283_v20, 4 }
  0xa1   : > { %v335_v59 = vrot.slane %v1476_v17, 2  ;;  %v336_v61 = vrot.slane %v283_v20, 2 }
  0xa2   : > { %379 = vrot.lane.b32.xlu2 %v375_v18, %s1331_s24  ;;  %347 = vrot.lane.b32.xlu0 %v343_v19, %s1332_s27 }
  0xa5   : > { %v285_v22 = vpop.f32.mrf.mxu1  ;;  %v256_v26 = vpop.f32.mrf.mxu0 }
  0xa6   : > { %v1481_v23 = vadd.f32 %v285_v22, %v211_v21  ;;  %v1484_v27 = vadd.f32 %v256_v26, %v211_v21 }
  0xa7   : > { %v259_v40 = vpop.f32.mrf.mxu2  ;;  %v288_v43 = vpop.f32.mrf.mxu3 }
  0xa8   : > { %322 = vrot.lane.b32.xlu1 %v283_v20, %s1330_s21  ;;  %v399_v25 = vrot.slane %v1481_v23, 2  ;;  %v398_v29 = vrot.slane %v1484_v27, 2  ;;  %v427_v19 = vpack.c.bf16 %v1481_v23, %v1484_v27 }
  0xaa   : > { %381 = vrot.lane.b32.xlu2 %v376_v24, %s1331_s24  ;;  %404 = vrot.lane.b32.xlu0 %v399_v25, %s1333_s28 }
  0xaf   : > { %v262_v6 = vpop.f32.mrf.mxu2  ;;  %v291_v10 = vpop.f32.mrf.mxu3 }
  0xb0   : > { %349 = vrot.lane.b32.xlu1 %v344_v28, %s1332_s27 }
  0xb2   : > { %402 = vrot.lane.b32.xlu2 %v398_v29, %s1333_s28  ;;  %v1015_v29 = vrot.slane %v427_v19, 10 }
  0xb8   : > { %215 = vperm.xlu1 %1135, %v201_v30  }
  0xba   : > { %220 = vperm.xlu2 %1136, %v202_v31  }
  0xfc   : > { %v380_v32 = vpop.permute.xlu2 %379 }
 0x104   : > { %v382_v33 = vpop.permute.xlu2 %381 }
 0x105   : > { %v385_v36 = vsel %vm383_vm1, %v382_v33, %v380_v32  ;;  %v384_v41 = vsel %vm383_vm1, %v380_v32, %v382_v33 }
 0x106   : > { %v390_v39 = vsel %vm373_vm2, %v385_v36, 0.0  ;;  %v393_v50 = vadd.f32 %v384_v41, %v1481_v23 }
 0x107   : > { %v392_v45 = vadd.f32 %v390_v39, %v1484_v27 }
 0x10c   : > { %v403_v44 = vpop.permute.xlu2 %402 }
 0x112   : > { %v321_v34 = vpop.permute.xlu1 %320 }
 0x114   : > { %v348_v35 = vpop.permute.xlu0 %347  ;;  %v221_v7 = vpop.permute.xlu2 %220 }
 0x115   : > { %v263_v1 = vadd.f32 %v262_v6, %v221_v7  ;;  %v292_v17 = vadd.f32 %v291_v10, %v221_v7 }
 0x117   : > { %v429_v25 = vpack.c.bf16 %v292_v17, %v263_v1 }
 0x119   : > { %v441_v31 = vrot.slane %v429_v25, 6 }
 0x11a   : > { %v323_v42 = vpop.permute.xlu1 %322 }
 0x11b   : > { %v326_v48 = vsel %vm324_vm3, %v323_v42, %v321_v34  ;;  %v325_v51 = vsel %vm324_vm3, %v321_v34, %v323_v42 }
 0x11c   : > { %v405_v49 = vpop.permute.xlu0 %404  ;;  %v331_v56 = vsel %vm1501_vm6, %v326_v48, 0.0  ;;  %v332_v58 = vsel %vm1505_vm7, %v325_v51, 0.0 }
 0x11d   : > { %v407_v52 = vsel %vm406_vm4, %v403_v44, %v405_v49  ;;  %v408_v53 = vsel %vm406_vm4, %v405_v49, %v403_v44  ;;  %v339_v63 = vadd.f32 %v335_v59, %v331_v56  ;;  %v340_v2 = vadd.f32 %v336_v61, %v332_v58 }
 0x11e   : > { %v414_v54 = vsel %vm395_vm5, %v408_v53, 0.0  ;;  %v415_v55 = vadd.f32 %v407_v52, %v392_v45 }
 0x11f   : > { %v416_v57 = vadd.f32 %v414_v54, %v393_v50 }
 0x120   : > { %v417_v60 = vmax.f32 %v415_v55, 0.0 }
 0x121   : > { %v418_v62 = vmax.f32 %v416_v57, 0.0 }
 0x122   : > { %v350_v0 = vpop.permute.xlu1 %349 }
 0x123   : > { %v419_v3 = vpack.c.bf16 %v418_v62, %v417_v60  ;;  %v352_v4 = vsel %vm351_vm8, %v348_v35, %v350_v0  ;;  %v353_v5 = vsel %vm351_vm8, %v350_v0, %v348_v35 }
 0x124   : > { %v358_v8 = vsel %vm341_vm9, %v352_v4, 0.0  ;;  %v359_v9 = vsel %vm342_vm10, %v353_v5, 0.0 }
 0x125   : > { %v421_v11 = vrot.slane %v419_v3, 3  ;;  %v360_v12 = vadd.f32 %v358_v8, %v339_v63  ;;  %v361_v13 = vadd.f32 %v359_v9, %v340_v2 }
 0x127   : > { %v424_v14 = vsel %vm367_vm11, %v419_v3, %v421_v11  ;;  %v362_v15 = vmax.f32 %v360_v12, 0.0  ;;  %v363_v16 = vmax.f32 %v361_v13, 0.0 }
 0x128   : > { %426 = vst [vmem:[#allocation3] sm:$0x3] %v424_v14 }
 0x129   : > { %v364_v18 = vpack.c.bf16 %v363_v16, %v362_v15 }
 0x12a   : > { %v216_v20 = vpop.permute.xlu1 %215 }
 0x12b   : > { %v366_v21 = vrot.slane %v364_v18, 3  ;;  %v260_v22 = vadd.f32 %v259_v40, %v216_v20  ;;  %v289_v24 = vadd.f32 %v288_v43, %v216_v20 }
 0x12d   : > { %v370_v26 = vsel %vm367_vm11, %v364_v18, %v366_v21  ;;  %v428_v28 = vpack.c.bf16 %v289_v24, %v260_v22 }
 0x12e   : > { %372 = vst [vmem:[#allocation2] sm:$0x3] %v370_v26 }
 0x12f   : > { %v438_v30 = vrot.slane %v428_v28, 6 }
 0x131   : > { %v439_v32 = vsel %vm435_vm14, %v1015_v29, %v438_v30  ;;  %v440_v33 = vrot.slane %v438_v30, 4 }
 0x132   : > { %445 = vst [vmem:[#allocation4] sm:$0xff] %v439_v32 }
 0x133   : > { %v442_v34 = vsel %vm435_vm14, %v440_v33, %v441_v31 }
 0x134   : > { %446 = vst [vmem:[#allocation4 + $0x8] sm:$0xff] %v442_v34 }
 0x135 PF: > { %s1016_s8 = sshll.u32 %s1311_s15, 7  ;;  %v452_v23 = vld [vmem:[#allocation3] sm:$0x3]  ;;  %vm498_vm15 = vcmask 1040384   ;;  %vm473_vm0 = vcmask 15360   ;;  %s1043_s27 = sshll.u32 %s1315_s16, 2 }
 0x136   : > { %s1521_s9 = sshra.s32 %s1016_s8, 7  ;;  %470 = vst [vmem:[#allocation1] ss:$9 sm:$0xff] %v452_v23  ;;  %s914_s28 = sadd.s32 %s1311_s15, %s1043_s27 }
 0x137   : > { %s450_s20 = scalar_lea.vmem [#allocation2], %s1521_s9  ;;  %s1033_s21 = sshll.u32 %s1521_s9, 3 }
 0x138   : > { %v451_v27 = vld [vmem:[%s450_s20] sm:$0x1]  ;;  %s860_s24 = scalar_lea.vmem %s1441_s10, %s1033_s21  ;;  %s1044_s29 = sshll.u32 %s914_s28, 3 }
 0x139   : > { %453 = vxpose.xlu0.c.b16.start.end [1/1] (short) %v451_v27, 128  ;;  %s916_s7 = scalar_lea.hbm %s1825_s3, %s1044_s29  ;;  %s917_s8 = sshll.u32 %s1443_s11, 4  ;;  %s918_s8 = int_to_ptr.vmem [resolvable:$true] %s917_s8 }
 0x13a   : > { %s919_s9 = sshll.u32 %s916_s7, 4  ;;  %s904_s15 = scalar_lea.sflag [#allocation6], %s175_s4  ;;  %s920_s9 = int_to_ptr.hbm [resolvable:$true] %s919_s9 }
 0x13b   : > { %s1247_s16 = sshra.s32 %s920_s9, 4  ;;  %s1248_s16 = int_to_ptr.hbm [resolvable:$true] %s1247_s16 }
 0x13c   : > { %s1249_s10 = scalar_lea.hbm %s1248_s16, 16  ;;  %p1254_p4 = scmp.lt.s32.totalorder %s1248_s16, %s1825_s3 }
 0x13d   : > { %v471_v35 = vld [vmem:[#allocation1] sm:$0xff]  ;;  %v472_v36 = vld [vmem:[#allocation1 + $0x9] sm:$0xff]  ;;  %p1250_p0 = scmp.ne.s32.totalorder %s1248_s16, %s1249_s10 }
 0x13e   : > { %v499_v37 = vsel %vm498_vm15, %v471_v35, 0  ;;  %v501_v38 = vsel %vm498_vm15, %v472_v36, 0 }
 0x13f   : > { %510 = vmatpush.bf16.msra.mxu0 %v499_v37  ;;  %559 = vmatpush.bf16.msra.mxu1 %v501_v38  ;;  %p1251_p1 = pnand %p1250_p0, %p1408_p3 }
 0x141   : > { %p1252_p2 = pneg %p1251_p1 }
 0x1e5   : > { %v461_v39 = vpop.trf.xlu0 }
 0x1e6   : > { %1017 = vmatmul.msk.bf16.vlgmr.msra.gmra.mxu0 %vm473_vm0, %v461_v39  ;;  %1025 = vmatmul.msk.bf16.vlgmr.msra.gmra.mxu1 %vm473_vm0, %v461_v39 }
 0x1f5   : > { %v462_v40 = vpop.trf.xlu0 }
 0x1f6   : > { %1018 = vmatmul.msk.bf16.gmra.mxu0 %vm473_vm0, %v462_v40  ;;  %1026 = vmatmul.msk.bf16.gmra.mxu1 %vm473_vm0, %v462_v40 }
 0x205   : > { %v463_v41 = vpop.trf.xlu0 }
 0x206   : > { %1019 = vmatmul.msk.bf16.gmra.mxu0 %vm473_vm0, %v463_v41  ;;  %1027 = vmatmul.msk.bf16.gmra.mxu1 %vm473_vm0, %v463_v41 }
 0x215   : > { %v464_v42 = vpop.trf.xlu0 }
 0x216   : > { %1020 = vmatmul.msk.bf16.gmra.mxu0 %vm473_vm0, %v464_v42  ;;  %1028 = vmatmul.msk.bf16.gmra.mxu1 %vm473_vm0, %v464_v42 }
 0x225   : > { %v465_v43 = vpop.trf.xlu0 }
 0x226   : > { %1021 = vmatmul.msk.bf16.gmra.mxu0 %vm473_vm0, %v465_v43  ;;  %1029 = vmatmul.msk.bf16.gmra.mxu1 %vm473_vm0, %v465_v43 }
 0x235   : > { %v466_v44 = vpop.trf.xlu0 }
 0x236   : > { %1022 = vmatmul.msk.bf16.gmra.mxu0 %vm473_vm0, %v466_v44  ;;  %1030 = vmatmul.msk.bf16.gmra.mxu1 %vm473_vm0, %v466_v44 }
 0x245   : > { %v467_v45 = vpop.trf.xlu0 }
 0x246   : > { %1023 = vmatmul.msk.bf16.gmra.mxu0 %vm473_vm0, %v467_v45  ;;  %1031 = vmatmul.msk.bf16.gmra.mxu1 %vm473_vm0, %v467_v45 }
 0x255   : > { %v468_v46 = vpop.trf.xlu0 }
 0x256   : > { %1024 = vmatmul.msk.bf16.gmra.mxu0 %vm473_vm0, %v468_v46  ;;  %1032 = vmatmul.msk.bf16.gmra.mxu1 %vm473_vm0, %v468_v46 }
 0x263   : > { %v1540_v47 = vpop.f32.mrf.mxu0  ;;  %v1542_v48 = vpop.f32.mrf.mxu1 }
 0x264   : > { %v601_v29 = vmax.f32 %v1540_v47, %v1542_v48 }
 0x26b   : > { %v1544_v49 = vpop.f32.mrf.mxu0  ;;  %v1546_v50 = vpop.f32.mrf.mxu1 }
 0x26c   : > { %v604_v32 = vmax.f32 %v1544_v49, %v1546_v50 }
 0x273   : > { %v1548_v51 = vpop.f32.mrf.mxu0  ;;  %v1550_v52 = vpop.f32.mrf.mxu1 }
 0x274   : > { %v607_v26 = vmax.f32 %v1548_v51, %v1550_v52 }
 0x27b   : > { %v1552_v53 = vpop.f32.mrf.mxu0  ;;  %v1554_v54 = vpop.f32.mrf.mxu1 }
 0x27c   : > { %v610_v31 = vmax.f32 %v1552_v53, %v1554_v54 }
 0x283   : > { %v1556_v55 = vpop.f32.mrf.mxu0  ;;  %v1558_v56 = vpop.f32.mrf.mxu1 }
 0x284   : > { %v613_v24 = vmax.f32 %v1556_v55, %v1558_v56 }
 0x28b   : > { %v1560_v57 = vpop.f32.mrf.mxu0  ;;  %v1562_v58 = vpop.f32.mrf.mxu1 }
 0x28c   : > { %v616_v30 = vmax.f32 %v1560_v57, %v1562_v58 }
 0x293   : > { %v1564_v59 = vpop.f32.mrf.mxu0  ;;  %v1566_v60 = vpop.f32.mrf.mxu1 }
 0x294   : > { %v619_v21 = vmax.f32 %v1564_v59, %v1566_v60 }
 0x29b   : > { %v1568_v61 = vpop.f32.mrf.mxu0  ;;  %v1570_v62 = vpop.f32.mrf.mxu1 }
 0x29c   : > { %v622_v28 = vmax.f32 %v1568_v61, %v1570_v62 }
 0x2a3   : > { %v1572_v63 = vpop.f32.mrf.mxu0  ;;  %v1574_v0 = vpop.f32.mrf.mxu1 }
 0x2a4   : > { %v625_v20 = vmax.f32 %v1572_v63, %v1574_v0 }
 0x2ab   : > { %v1576_v2 = vpop.f32.mrf.mxu0  ;;  %v1578_v3 = vpop.f32.mrf.mxu1 }
 0x2ac   : > { %v628_v25 = vmax.f32 %v1576_v2, %v1578_v3 }
 0x2b3   : > { %v1580_v4 = vpop.f32.mrf.mxu0  ;;  %v1582_v5 = vpop.f32.mrf.mxu1 }
 0x2b4   : > { %v631_v15 = vmax.f32 %v1580_v4, %v1582_v5 }
 0x2bb   : > { %v1584_v6 = vpop.f32.mrf.mxu0  ;;  %v1586_v7 = vpop.f32.mrf.mxu1 }
 0x2bc   : > { %v634_v22 = vmax.f32 %v1584_v6, %v1586_v7 }
 0x2c3   : > { %v542_v8 = vpop.f32.mrf.mxu0  ;;  %v591_v9 = vpop.f32.mrf.mxu1 }
 0x2c4   : > { %v637_v10 = vmax.f32 %v542_v8, %v591_v9 }
 0x2c6   : > { %638 = vmax.xlane.f32.xlu1 %v637_v10 }
 0x2cb   : > { %v1588_v11 = vpop.f32.mrf.mxu0  ;;  %v1590_v12 = vpop.f32.mrf.mxu1 }
 0x2cc   : > { %v640_v13 = vmax.f32 %v1588_v11, %v1590_v12 }
 0x2ce   : > { %641 = vmax.xlane.f32.xlu2 %v640_v13 }
 0x2d3   : > { %v547_v1 = vpop.f32.mrf.mxu0  ;;  %v596_v14 = vpop.f32.mrf.mxu1 }
 0x2d4   : > { %v643_v16 = vmax.f32 %v547_v1, %v596_v14 }
 0x2d6   : > { %632 = vmax.xlane.f32.xlu2 %v631_v15  ;;  %644 = vmax.xlane.f32.xlu0 %v643_v16 }
 0x2db   : > { %v549_v17 = vpop.f32.mrf.mxu0  ;;  %v598_v18 = vpop.f32.mrf.mxu1 }
 0x2dc   : > { %v646_v19 = vmax.f32 %v549_v17, %v598_v18 }
 0x2de   : > { %626 = vmax.xlane.f32.xlu2 %v625_v20  ;;  %647 = vmax.xlane.f32.xlu1 %v646_v19 }
 0x2e6   : > { %620 = vmax.xlane.f32.xlu2 %v619_v21  ;;  %635 = vmax.xlane.f32.xlu1 %v634_v22 }
 0x2ee   : > { %614 = vmax.xlane.f32.xlu2 %v613_v24  ;;  %629 = vmax.xlane.f32.xlu1 %v628_v25 }
 0x2f6   : > { %608 = vmax.xlane.f32.xlu2 %v607_v26  ;;  %623 = vmax.xlane.f32.xlu1 %v622_v28 }
 0x2fe   : > { %602 = vmax.xlane.f32.xlu2 %v601_v29  ;;  %617 = vmax.xlane.f32.xlu1 %v616_v30 }
 0x306   : > { %611 = vmax.xlane.f32.xlu1 %v610_v31 }
 0x30e   : > { %605 = vmax.xlane.f32.xlu1 %v604_v32 }
 0x339   : > { %v639_v34 = vpop.xlane.xlu1 %638 }
 0x33a   : > { %v673_v39 = vsub.f32 %v542_v8, %v639_v34  ;;  %v674_v40 = vsub.f32 %v591_v9, %v639_v34 }
 0x33c   : > { %v729_v43 = vmul.f32 1.442695, %v673_v39  ;;  %v731_v46 = vmul.f32 1.442695, %v674_v40 }
 0x341   : > { %v642_v33 = vpop.xlane.xlu2 %641 }
 0x342   : > { %v675_v10 = vsub.f32 %v1588_v11, %v642_v33  ;;  %v676_v15 = vsub.f32 %v1590_v12, %v642_v33 }
 0x344   : > { %v733_v19 = vmul.f32 1.442695, %v675_v10  ;;  %v735_v11 = vmul.f32 1.442695, %v676_v15 }
 0x349   : > { %v633_v23 = vpop.xlane.xlu2 %632  ;;  %v645_v27 = vpop.xlane.xlu0 %644 }
 0x34a   : > { %v677_v35 = vsub.f32 %v547_v1, %v645_v27  ;;  %v678_v36 = vsub.f32 %v596_v14, %v645_v27  ;;  %v669_v8 = vsub.f32 %v1580_v4, %v633_v23  ;;  %v670_v14 = vsub.f32 %v1582_v5, %v633_v23 }
 0x34c   : > { %v737_v37 = vmul.f32 1.442695, %v677_v35  ;;  %v739_v38 = vmul.f32 1.442695, %v678_v36  ;;  %v721_v12 = vmul.f32 1.442695, %v669_v8 }
 0x34d   : > { %v723_v20 = vmul.f32 1.442695, %v670_v14 }
 0x34e   : > { %1137 = vpow2.f32 %v737_v37 }
 0x34f   : > { %1139 = vpow2.f32 %v739_v38 }
 0x350   : > { %1141 = vpow2.f32 %v729_v43 }
 0x351   : > { %v627_v41 = vpop.xlane.xlu2 %626  ;;  %v648_v42 = vpop.xlane.xlu1 %647  ;;  %1143 = vpow2.f32 %v731_v46 }
 0x352   : > { %v679_v44 = vsub.f32 %v549_v17, %v648_v42  ;;  %v680_v45 = vsub.f32 %v598_v18, %v648_v42  ;;  %v665_v4 = vsub.f32 %v1572_v63, %v627_v41  ;;  %v666_v5 = vsub.f32 %v1574_v0, %v627_v41 }
 0x354   : > { %v741_v13 = vmul.f32 1.442695, %v679_v44  ;;  %v743_v16 = vmul.f32 1.442695, %v680_v45  ;;  %v1620_v1 = vpop.eup %1137  ;;  %v713_v30 = vmul.f32 1.442695, %v665_v4 }
 0x355   : > { %v1623_v9 = vpop.eup %1139  ;;  %v715_v32 = vmul.f32 1.442695, %v666_v5 }
 0x356   : > { %1145 = vpow2.f32 %v741_v13  ;;  %v787_v17 = vadd.f32 %v1623_v9, %v1620_v1  ;;  %v1628_v22 = vpop.eup %1141 }
 0x357   : > { %1147 = vpow2.f32 %v743_v16  ;;  %v1631_v24 = vpop.eup %1143 }
 0x358   : > { %788 = vadd.xlane.f32.xlu2 %v787_v17  ;;  %1149 = vpow2.f32 %v733_v19  ;;  %v781_v31 = vadd.f32 %v1631_v24, %v1628_v22 }
 0x359   : > { %v636_v18 = vpop.xlane.xlu1 %635  ;;  %v621_v21 = vpop.xlane.xlu2 %620  ;;  %1151 = vpow2.f32 %v735_v11 }
 0x35a   : > { %1153 = vpow2.f32 %v721_v12  ;;  %v671_v26 = vsub.f32 %v1584_v6, %v636_v18  ;;  %v672_v29 = vsub.f32 %v1586_v7, %v636_v18  ;;  %v661_v7 = vsub.f32 %v1564_v59, %v621_v21 }
 0x35b   : > { %1155 = vpow2.f32 %v723_v20  ;;  %v662_v36 = vsub.f32 %v1566_v60, %v621_v21 }
 0x35c   : > { %v1634_v25 = vpop.eup %1145  ;;  %v725_v34 = vmul.f32 1.442695, %v671_v26  ;;  %v727_v23 = vmul.f32 1.442695, %v672_v29  ;;  %1157 = vpow2.f32 %v713_v30  ;;  %v705_v40 = vmul.f32 1.442695, %v661_v7 }
 0x35d   : > { %v1637_v28 = vpop.eup %1147  ;;  %1159 = vpow2.f32 %v715_v32  ;;  %v707_v59 = vmul.f32 1.442695, %v662_v36 }
 0x35e   : > { %v790_v63 = vadd.f32 %v1637_v28, %v1634_v25  ;;  %v1644_v0 = vpop.eup %1149  ;;  %1161 = vpow2.f32 %v725_v34 }
 0x35f   : > { %v1646_v6 = vpop.eup %1151  ;;  %1163 = vpow2.f32 %v727_v23 }
 0x360   : > { %782 = vadd.xlane.f32.xlu2 %v781_v31  ;;  %791 = vadd.xlane.f32.xlu1 %v790_v63  ;;  %v1648_v27 = vpop.eup %1153  ;;  %v784_v42 = vadd.f32 %v1646_v6, %v1644_v0  ;;  %1165 = vpow2.f32 %v705_v40 }
 0x361   : > { %v630_v33 = vpop.xlane.xlu1 %629  ;;  %v1651_v35 = vpop.eup %1155  ;;  %1167 = vpow2.f32 %v707_v59 }
 0x362   : > { %v615_v37 = vpop.xlane.xlu2 %614  ;;  %v667_v38 = vsub.f32 %v1576_v2, %v630_v33  ;;  %v668_v39 = vsub.f32 %v1578_v3, %v630_v33  ;;  %v775_v41 = vadd.f32 %v1651_v35, %v1648_v27  ;;  %v1660_v44 = vpop.eup %1157 }
 0x363   : > { %v1662_v60 = vpop.eup %1159  ;;  %v657_v3 = vsub.f32 %v1556_v55, %v615_v37  ;;  %v658_v13 = vsub.f32 %v1558_v56, %v615_v37 }
 0x364   : > { %v717_v45 = vmul.f32 1.442695, %v667_v38  ;;  %v719_v2 = vmul.f32 1.442695, %v668_v39  ;;  %v1664_v46 = vpop.eup %1161  ;;  %v769_v19 = vadd.f32 %v1662_v60, %v1660_v44 }
 0x365   : > { %v1667_v10 = vpop.eup %1163  ;;  %v697_v14 = vmul.f32 1.442695, %v657_v3  ;;  %v699_v55 = vmul.f32 1.442695, %v658_v13 }
 0x366   : > { %1169 = vpow2.f32 %v717_v45  ;;  %v778_v17 = vadd.f32 %v1667_v10, %v1664_v46  ;;  %v1676_v18 = vpop.eup %1165 }
 0x367   : > { %1171 = vpow2.f32 %v719_v2  ;;  %v1678_v56 = vpop.eup %1167 }
 0x368   : > { %776 = vadd.xlane.f32.xlu2 %v775_v41  ;;  %785 = vadd.xlane.f32.xlu1 %v784_v42  ;;  %1173 = vpow2.f32 %v697_v14  ;;  %v763_v30 = vadd.f32 %v1678_v56, %v1676_v18 }
 0x369   : > { %v624_v43 = vpop.xlane.xlu1 %623  ;;  %1175 = vpow2.f32 %v699_v55 }
 0x36a   : > { %v663_v15 = vsub.f32 %v1568_v61, %v624_v43  ;;  %v609_v16 = vpop.xlane.xlu2 %608  ;;  %v664_v8 = vsub.f32 %v1570_v62, %v624_v43 }
 0x36b   : > { %v653_v62 = vsub.f32 %v1548_v51, %v609_v16  ;;  %v654_v4 = vsub.f32 %v1550_v52, %v609_v16 }
 0x36c   : > { %v709_v12 = vmul.f32 1.442695, %v663_v15  ;;  %v711_v61 = vmul.f32 1.442695, %v664_v8  ;;  %v1680_v20 = vpop.eup %1169 }
 0x36d   : > { %v1683_v21 = vpop.eup %1171  ;;  %v689_v29 = vmul.f32 1.442695, %v653_v62  ;;  %v691_v63 = vmul.f32 1.442695, %v654_v4 }
 0x36e   : > { %1177 = vpow2.f32 %v709_v12  ;;  %v772_v31 = vadd.f32 %v1683_v21, %v1680_v20  ;;  %v1692_v33 = vpop.eup %1173 }
 0x36f   : > { %1179 = vpow2.f32 %v711_v61  ;;  %v1694_v52 = vpop.eup %1175 }
 0x370   : > { %770 = vadd.xlane.f32.xlu2 %v769_v19  ;;  %779 = vadd.xlane.f32.xlu1 %v778_v17  ;;  %1181 = vpow2.f32 %v689_v29  ;;  %v757_v40 = vadd.f32 %v1694_v52, %v1692_v33 }
 0x371   : > { %v618_v11 = vpop.xlane.xlu1 %617  ;;  %1183 = vpow2.f32 %v691_v63 }
 0x372   : > { %v659_v5 = vsub.f32 %v1560_v57, %v618_v11  ;;  %v660_v26 = vsub.f32 %v1562_v58, %v618_v11  ;;  %v603_v51 = vpop.xlane.xlu2 %602 }
 0x373   : > { %v649_v58 = vsub.f32 %v1540_v47, %v603_v51  ;;  %v650_v36 = vsub.f32 %v1542_v48, %v603_v51 }
 0x374   : > { %v701_v34 = vmul.f32 1.442695, %v659_v5  ;;  %v703_v57 = vmul.f32 1.442695, %v660_v26  ;;  %v1696_v23 = vpop.eup %1177 }
 0x375   : > { %v1699_v7 = vpop.eup %1179  ;;  %v681_v39 = vmul.f32 1.442695, %v649_v58  ;;  %v683_v42 = vmul.f32 1.442695, %v650_v36 }
 0x376   : > { %1185 = vpow2.f32 %v701_v34  ;;  %v766_v41 = vadd.f32 %v1699_v7, %v1696_v23  ;;  %v1708_v47 = vpop.eup %1181 }
 0x377   : > { %1187 = vpow2.f32 %v703_v57  ;;  %v1710_v48 = vpop.eup %1183 }
 0x378   : > { %764 = vadd.xlane.f32.xlu2 %v763_v30  ;;  %773 = vadd.xlane.f32.xlu1 %v772_v31  ;;  %1189 = vpow2.f32 %v681_v39  ;;  %v751_v13 = vadd.f32 %v1710_v48, %v1708_v47 }
 0x379   : > { %v612_v32 = vpop.xlane.xlu1 %611  ;;  %1191 = vpow2.f32 %v683_v42 }
 0x37a   : > { %v655_v37 = vsub.f32 %v1552_v53, %v612_v32  ;;  %v656_v38 = vsub.f32 %v1554_v54, %v612_v32 }
 0x37c   : > { %v693_v59 = vmul.f32 1.442695, %v655_v37  ;;  %v695_v43 = vmul.f32 1.442695, %v656_v38  ;;  %v1712_v45 = vpop.eup %1185 }
 0x37d   : > { %v1714_v54 = vpop.eup %1187 }
 0x37e   : > { %1193 = vpow2.f32 %v693_v59  ;;  %v760_v15 = vadd.f32 %v1714_v54, %v1712_v45  ;;  %v1722_v16 = vpop.eup %1189 }
 0x37f   : > { %1195 = vpow2.f32 %v695_v43  ;;  %v1724_v14 = vpop.eup %1191 }
 0x380   : > { %758 = vadd.xlane.f32.xlu2 %v757_v40  ;;  %767 = vadd.xlane.f32.xlu1 %v766_v41 }
 0x381   : > { %v606_v53 = vpop.xlane.xlu1 %605 }
 0x382   : > { %v651_v2 = vsub.f32 %v1544_v49, %v606_v53  ;;  %v652_v3 = vsub.f32 %v1546_v50, %v606_v53  ;;  %v745_v50 = vadd.f32 %v1724_v14, %v1722_v16 }
 0x384   : > { %v685_v8 = vmul.f32 1.442695, %v651_v2  ;;  %v687_v19 = vmul.f32 1.442695, %v652_v3  ;;  %v1726_v17 = vpop.eup %1193 }
 0x385   : > { %v1728_v49 = vpop.eup %1195 }
 0x386   : > { %1197 = vpow2.f32 %v685_v8  ;;  %v754_v55 = vadd.f32 %v1728_v49, %v1726_v17 }
 0x387   : > { %1199 = vpow2.f32 %v687_v19 }
 0x388   : > { %752 = vadd.xlane.f32.xlu2 %v751_v13  ;;  %761 = vadd.xlane.f32.xlu1 %v760_v15 }
 0x38c   : > { %v1734_v11 = vpop.eup %1197 }
 0x38d   : > { %v1736_v12 = vpop.eup %1199 }
 0x38e   : > { %v748_v61 = vadd.f32 %v1736_v12, %v1734_v11 }
 0x390   : > { %746 = vadd.xlane.f32.xlu2 %v745_v50  ;;  %755 = vadd.xlane.f32.xlu1 %v754_v55 }
 0x398   : > { %749 = vadd.xlane.f32.xlu1 %v748_v61 }
 0x3cb   : > { %v789_v62 = vpop.xlane.xlu2 %788 }
 0x3cc   : > { %1201 = vrcp.f32 %v789_v62 }
 0x3d2   : > { %v1202_v26 = vpop.eup %1201 }
 0x3d3   : > { %v783_v4 = vpop.xlane.xlu2 %782  ;;  %v792_v5 = vpop.xlane.xlu1 %791  ;;  %v837_v63 = vmul.f32 %v1202_v26, %v1620_v1  ;;  %v838_v32 = vmul.f32 %v1202_v26, %v1623_v9 }
 0x3d4   : > { %1203 = vrcp.f32 %v792_v5 }
 0x3d5   : > { %1205 = vrcp.f32 %v783_v4 }
 0x3da   : > { %v1204_v29 = vpop.eup %1203 }
 0x3db   : > { %v777_v30 = vpop.xlane.xlu2 %776  ;;  %v786_v31 = vpop.xlane.xlu1 %785  ;;  %v839_v51 = vmul.f32 %v1204_v29, %v1634_v25  ;;  %v840_v34 = vmul.f32 %v1204_v29, %v1637_v28 }
 0x3dc   : > { %1207 = vrcp.f32 %v786_v31  ;;  %v1206_v36 = vpop.eup %1205 }
 0x3dd   : > { %v857_v57 = vpack.c.bf16 %v839_v51, %v837_v63  ;;  %v858_v58 = vpack.c.bf16 %v840_v34, %v838_v32  ;;  %1209 = vrcp.f32 %v777_v30  ;;  %v833_v40 = vmul.f32 %v1206_v36, %v1628_v22 }
 0x3de   : > { %v834_v25 = vmul.f32 %v1206_v36, %v1631_v24 }
 0x3df   : > { %873 = vmatpush.bf16.xpose.msra.mxu2 %v857_v57  ;;  %887 = vmatpush.bf16.xpose.msra.mxu3 %v858_v58 }
 0x3e2   : > { %v1208_v37 = vpop.eup %1207 }
 0x3e3   : > { %v771_v38 = vpop.xlane.xlu2 %770  ;;  %v780_v39 = vpop.xlane.xlu1 %779  ;;  %v835_v1 = vmul.f32 %v1208_v37, %v1644_v0  ;;  %v836_v9 = vmul.f32 %v1208_v37, %v1646_v6 }
 0x3e4   : > { %1211 = vrcp.f32 %v780_v39  ;;  %v1210_v42 = vpop.eup %1209 }
 0x3e5   : > { %v855_v28 = vpack.c.bf16 %v835_v1, %v833_v40  ;;  %v856_v41 = vpack.c.bf16 %v836_v9, %v834_v25  ;;  %1213 = vrcp.f32 %v771_v38  ;;  %v829_v2 = vmul.f32 %v1210_v42, %v1648_v27  ;;  %v1036_v9 = vld [vmem:[#allocation4] sm:$0xf] }
 0x3e6   : > { %v830_v0 = vmul.f32 %v1210_v42, %v1651_v35  ;;  %v1038_v42 = vld [vmem:[#allocation4 + $0x8] sm:$0xf0] }
 0x3e7   : > { %874 = vmatpush.bf16.xpose.msra.mxu2 %v855_v28  ;;  %888 = vmatpush.bf16.xpose.msra.mxu3 %v856_v41  ;;  %v1049_v28 = vld [vmem:[#allocation4 + $0x4] sm:$0xf0]  ;;  %v1048_v41 = vld [vmem:[#allocation4 + $0x4] sm:$0xf] }
 0x3ea   : > { %v1212_v59 = vpop.eup %1211 }
 0x3eb   : > { %v765_v43 = vpop.xlane.xlu2 %764  ;;  %v774_v53 = vpop.xlane.xlu1 %773  ;;  %v831_v22 = vmul.f32 %v1212_v59, %v1664_v46  ;;  %v832_v24 = vmul.f32 %v1212_v59, %v1667_v10  ;;  %v1041_v59 = vor.u32 %v1048_v41, %v1038_v42 }
 0x3ec   : > { %1215 = vrcp.f32 %v774_v53  ;;  %v1214_v13 = vpop.eup %1213 }
 0x3ed   : > { %v853_v6 = vpack.c.bf16 %v831_v22, %v829_v2  ;;  %v854_v3 = vpack.c.bf16 %v832_v24, %v830_v0  ;;  %1217 = vrcp.f32 %v765_v43  ;;  %v825_v50 = vmul.f32 %v1214_v13, %v1660_v44  ;;  %v862_v2 = vld [vmem:[%s860_s24 + $0x10] sm:$0xff] }
 0x3ee   : > { %v826_v46 = vmul.f32 %v1214_v13, %v1662_v60 }
 0x3ef   : > { %875 = vmatpush.bf16.xpose.msra.mxu2 %v853_v6  ;;  %889 = vmatpush.bf16.xpose.msra.mxu3 %v854_v3 }
 0x3f2   : > { %v1216_v15 = vpop.eup %1215 }
 0x3f3   : > { %v759_v8 = vpop.xlane.xlu2 %758  ;;  %v768_v19 = vpop.xlane.xlu1 %767  ;;  %v827_v27 = vmul.f32 %v1216_v15, %v1680_v20  ;;  %v828_v35 = vmul.f32 %v1216_v15, %v1683_v21 }
 0x3f4   : > { %1219 = vrcp.f32 %v768_v19  ;;  %v1218_v61 = vpop.eup %1217 }
 0x3f5   : > { %v851_v10 = vpack.c.bf16 %v827_v27, %v825_v50  ;;  %v852_v55 = vpack.c.bf16 %v828_v35, %v826_v46  ;;  %1221 = vrcp.f32 %v759_v8  ;;  %v821_v5 = vmul.f32 %v1218_v61, %v1676_v18 }
 0x3f6   : > { %v822_v44 = vmul.f32 %v1218_v61, %v1678_v56 }
 0x3f7   : > { %876 = vmatpush.bf16.xpose.msra.mxu2 %v851_v10  ;;  %890 = vmatpush.bf16.xpose.msra.mxu3 %v852_v55 }
 0x3fa   : > { %v1220_v62 = vpop.eup %1219 }
 0x3fb   : > { %v762_v4 = vpop.xlane.xlu1 %761  ;;  %v823_v26 = vmul.f32 %v1220_v62, %v1696_v23  ;;  %v824_v20 = vmul.f32 %v1220_v62, %v1699_v7  ;;  %v753_v60 = vpop.xlane.xlu2 %752 }
 0x3fc   : > { %1223 = vrcp.f32 %v762_v4  ;;  %v1222_v30 = vpop.eup %1221 }
 0x3fd   : > { %v849_v21 = vpack.c.bf16 %v823_v26, %v821_v5  ;;  %v850_v29 = vpack.c.bf16 %v824_v20, %v822_v44  ;;  %1225 = vrcp.f32 %v753_v60  ;;  %v817_v51 = vmul.f32 %v1222_v30, %v1692_v33 }
 0x3fe   : > { %v818_v23 = vmul.f32 %v1222_v30, %v1694_v52 }
 0x3ff   : > { %877 = vmatpush.bf16.xpose.msra.mxu2 %v849_v21  ;;  %891 = vmatpush.bf16.xpose.msra.mxu3 %v850_v29 }
 0x402   : > { %v1224_v31 = vpop.eup %1223 }
 0x403   : > { %v756_v63 = vpop.xlane.xlu1 %755  ;;  %v819_v18 = vmul.f32 %v1224_v31, %v1712_v45  ;;  %v820_v56 = vmul.f32 %v1224_v31, %v1714_v54  ;;  %v747_v34 = vpop.xlane.xlu2 %746 }
 0x404   : > { %1227 = vrcp.f32 %v756_v63  ;;  %v1226_v57 = vpop.eup %1225 }
 0x405   : > { %v847_v7 = vpack.c.bf16 %v819_v18, %v817_v51  ;;  %v848_v32 = vpack.c.bf16 %v820_v56, %v818_v23  ;;  %1229 = vrcp.f32 %v747_v34  ;;  %v813_v37 = vmul.f32 %v1226_v57, %v1708_v47 }
 0x406   : > { %v814_v45 = vmul.f32 %v1226_v57, %v1710_v48 }
 0x407   : > { %878 = vmatpush.bf16.xpose.msra.mxu2 %v847_v7  ;;  %892 = vmatpush.bf16.xpose.msra.mxu3 %v848_v32 }
 0x40a   : > { %v1228_v58 = vpop.eup %1227 }
 0x40b   : > { %v750_v36 = vpop.xlane.xlu1 %749  ;;  %v815_v33 = vmul.f32 %v1228_v58, %v1726_v17  ;;  %v816_v52 = vmul.f32 %v1228_v58, %v1728_v49  ;;  %v1230_v39 = vpop.eup %1229 }
 0x40c   : > { %1231 = vrcp.f32 %v750_v36  ;;  %v809_v1 = vmul.f32 %v1230_v39, %v1722_v16  ;;  %v810_v47 = vmul.f32 %v1230_v39, %v1724_v14  ;;  %v1037_v16 = vor.u32 %v1049_v28, %v1036_v9  ;;  %v861_v14 = vld [vmem:[%s860_s24] sm:$0xff]  ;;  %s1253_s24 = scalar_lea.hbm %s1825_s3, 64 }
 0x40d   : > { %v845_v54 = vpack.c.bf16 %v815_v33, %v813_v37  ;;  %v846_v38 = vpack.c.bf16 %v816_v52, %v814_v45  ;;  %p1255_p5 = scmp.lt.s32.totalorder %s1253_s24, %s1249_s10 }
 0x40f   : > { %879 = vmatpush.bf16.xpose.msra.mxu2 %v845_v54  ;;  %893 = vmatpush.bf16.xpose.msra.mxu3 %v846_v38  ;;  %p1256_p6 = por %p1255_p5, %p1254_p4 }
 0x411   : > { %p1257_p7 = pnand %p1256_p6, %p1252_p2 }
 0x412   : > { %v1232_v40 = vpop.eup %1231 }
 0x413   : > { %v811_v25 = vmul.f32 %v1232_v40, %v1734_v11  ;;  %v812_v17 = vmul.f32 %v1232_v40, %v1736_v12 }
 0x415   : > { %v843_v48 = vpack.c.bf16 %v811_v25, %v809_v1  ;;  %v844_v49 = vpack.c.bf16 %v812_v17, %v810_v47 }
 0x417   : > { %880 = vmatpush.bf16.xpose.msra.mxu2 %v843_v48  ;;  %894 = vmatpush.bf16.xpose.msra.mxu3 %v844_v49 }
 0x41e   : > { %881 = vmatmul.bf16.vlgmr.msra.gmra.mxu2 %v1037_v16  ;;  %895 = vmatmul.bf16.vlgmr.msra.gmra.mxu3 %v1041_v59 }
 0x4a1   : > { %v882_v11 = vpop.f32.mrf.mxu2  ;;  %v896_v12 = vpop.f32.mrf.mxu3 }
 0x4a2   : > { %v883_v43 = vadd.f32 %v882_v11, %v861_v14 }
 0x4a4   : > { %v897_v53 = vadd.f32 %v896_v12, %v883_v43 }
 0x4a6   : > { %901 = vst [vmem:[%s1443_s11] sm:$0xff] %v897_v53 }
 0x4a9   : > { %v884_v22 = vpop.f32.mrf.mxu2  ;;  %v898_v24 = vpop.f32.mrf.mxu3 }
 0x4aa   : > { %v885_v0 = vadd.f32 %v884_v22, %v862_v2 }
 0x4ac   : > { %v899_v6 = vadd.f32 %v898_v24, %v885_v0 }
 0x4ae   : > { %902 = vst [vmem:[%s1443_s11 + $0x8] sm:$0xff] %v899_v6 }
 0x4af   : > { %1260 = shalt.err (!%p1257_p7)
}
 0x4b0   : > { %s1334_s4 = smov 128   ;;  %s1335_s11 = smov 256  }
 0x4b1   : > { %s1336_s29 = smov 8  }
 0x4b2   : > { %1054 = dma.vmem_to_hbm [thread:$0]  (%p1408_p3), %s918_s8, 256, %s920_s9, %s904_s15, %s1334_s4, %s1335_s11, %s1336_s29  }
 0x4b3 PF: > { %p1060_p9 = scmp.ge.s32.totalorder %s1327_s19, 2  ;;  %s934_s5 = sand.u32 1, %s1299_s12  }
 0x4b4   : > { %s935_s6 = scalar_lea.sflag [#allocation6], %s934_s5 }
 0x4b5   : > { %p1057_p10 = pnand %p1060_p9, %p1417_p8 }
 0x4b7   : > { %p1058_p11 = pneg %p1057_p10 }
 0x4b9   : > { %1294 = dma.done.wait (%p1058_p11), %s935_s6, 256  }
 0x4ba   : > { %1296 = vsyncadd (%p1058_p11), %s935_s6, 4294967040  ;;  %s16_s19 = sadd.s32 1, %s1327_s19   ;;  %s1832_s12 = smov %s1303_s13 }
 0x4bb   : > { %p13_p12 = scmp.ge.s32.totalorder %s16_s19, 6   ;;  %s1833_s13 = smov %s1307_s14 }
 0x4bc   : > { %s1834_s14 = smov %s1426_s30  ;;  %s1835_s15 = smov %s1319_s17 }
 0x4bd   : > { %s1836_s16 = smov %s1323_s18  ;;  %s1837_s17 = smov %s1840_s22 }
 0x4be   : > { %s1838_s18 = smov %s1844_s23  ;;  %15 = sbr.rel (!%p13_p12) target bundleno = 5 (0x5), region = 73 }
 0x4c3   :  { %941 = vsyncpa [#allocation6], 1 }
 0x4c4   :  { %943 = vsyncpa [#allocation6 + $0x1], 1 }

</bundles_post_ra>
